<compile_context>
chip_gen: v7x
topology: tpu7x:2x2x1
jax: 0.10.0
libtpu: 0.0.40
codegen_flags: <defaults>
</compile_context>

<pallas_src>
import functools

import jax
import jax.numpy as jnp
from jax import lax
from jax.experimental import pallas as pl
from jax.experimental.pallas import tpu as pltpu


def _round_up(x, m):
    return ((x + m - 1) // m) * m


def _gemm_bias_relu_kernel(x_ref, w_ref, b_ref, o_ref, acc_ref):
    # x_ref: (tr, tk) bf16 patches    w_ref: (tk, tn) bf16 fused weights
    # b_ref: (1, tn)  f32 fused bias  o_ref: (tr, tn) output tile
    # acc_ref: (tr, tn) f32 VMEM accumulator, resident across the k axis.
    @pl.when(pl.program_id(2) == 0)
    def _init():
        acc_ref[...] = jnp.zeros_like(acc_ref)

    acc_ref[...] += jnp.dot(
        x_ref[...], w_ref[...], preferred_element_type=jnp.float32
    )

    @pl.when(pl.program_id(2) == pl.num_programs(2) - 1)
    def _store():
        acc = acc_ref[...] + b_ref[...]          # bias (free VALU epilogue)
        o_ref[...] = jnp.maximum(acc, 0.0).astype(o_ref.dtype)   # ReLU


def conv_bn_relu(
    x_nchw,
    weight_oihw,
    conv_bias,
    bn_gamma,
    bn_beta,
    bn_mean,
    bn_var,
    *,
    eps=1e-5,
    stride=(1, 1),
    padding=(1, 1),
    dilation=(1, 1),
    groups=1,
    compute_dtype=jnp.bfloat16,   # bf16 MXU path; f32 accumulation in-kernel
    tile_rows=256,                # >=256 implicit-GEMM rows per MXU dot
):
    assert groups == 1  # TODO(synk): grouped/depthwise conv not implemented.

    N, Cin, H, W = x_nchw.shape
    Cout, _, KH, KW = weight_oihw.shape
    sh, sw = stride
    ph, pw = padding
    dh, dw = dilation
    Ho = (H + 2 * ph - dh * (KH - 1) - 1) // sh + 1
    Wo = (W + 2 * pw - dw * (KW - 1) - 1) // sw + 1
    out_dtype = x_nchw.dtype

    # --- BN folding (matches ConvBatchNormReLU.__init__), done in f32 ---
    scale = (bn_gamma.astype(jnp.float32)
             / jnp.sqrt(bn_var.astype(jnp.float32) + eps))
    w_fused = weight_oihw.astype(jnp.float32) * scale[:, None, None, None]
    b_fused = (scale * (conv_bias.astype(jnp.float32) - bn_mean.astype(jnp.float32))
               + bn_beta.astype(jnp.float32))

    # --- implicit-GEMM problem sizes ---
    K = KH * KW * Cin
    K_pad = _round_up(K, 128)
    if K_pad > 1024:
        tk = 512
        K_pad = _round_up(K_pad, tk)
    else:
        tk = K_pad
    cout_align = 128 if Cout <= 128 else 256      # 256-granular N for v6e/v7x MXU
    Cout_pad = _round_up(Cout, cout_align)
    tn = min(Cout_pad, 256)
    rows = N * Ho * Wo
    tr = tile_rows if rows >= tile_rows else _round_up(rows, 8)
    rows_pad = _round_up(rows, tr)

    # --- lane-dense patch extraction (wrapper-side XLA strided slices) ---
    # TODO(synk): fold these transposes / the patch materialization into the
    # producer (keep NHWC end-to-end) to drop the extra HBM round trips.
    x_nhwc = jnp.transpose(x_nchw, (0, 2, 3, 1)).astype(compute_dtype)
    xp = jnp.pad(x_nhwc, ((0, 0), (ph, ph), (pw, pw), (0, 0)))
    taps = []
    for kh in range(KH):
        for kw in range(KW):
            taps.append(
                lax.slice(
                    xp,
                    (0, kh * dh, kw * dw, 0),
                    (N, kh * dh + (Ho - 1) * sh + 1,
                     kw * dw + (Wo - 1) * sw + 1, Cin),
                    (1, sh, sw, 1),
                )
            )  # (N, Ho, Wo, Cin) per tap
    patches = jnp.concatenate(taps, axis=-1)       # (N, Ho, Wo, KH*KW*Cin)
    patches = patches.reshape(rows, K)
    patches = jnp.pad(patches, ((0, rows_pad - rows), (0, K_pad - K)))

    # Weights flattened in the matching (kh, kw, cin) order; lane-dense Cout.
    w_k = jnp.transpose(w_fused, (2, 3, 1, 0)).reshape(K, Cout)
    w_k = jnp.pad(w_k, ((0, K_pad - K), (0, Cout_pad - Cout))).astype(compute_dtype)
    b_k = jnp.pad(b_fused, (0, Cout_pad - Cout)).reshape(1, Cout_pad)
    b_k = b_k.astype(jnp.float32)

    nr = rows_pad // tr
    nc = Cout_pad // tn
    nk = K_pad // tk

    cd_b = jnp.dtype(compute_dtype).itemsize
    out_b = jnp.dtype(out_dtype).itemsize
    # Double-buffered inputs + output + f32 accumulator, with headroom.
    footprint = (2 * (tr * tk + tk * tn) * cd_b
                 + 2 * 8 * tn * 4
                 + 2 * tr * tn * out_b
                 + tr * tn * 4)
    vmem_limit = int(min(48 * 1024 * 1024, max(2 * footprint, 16 * 1024 * 1024)))

    out2d = pl.pallas_call(
        _gemm_bias_relu_kernel,
        out_shape=jax.ShapeDtypeStruct((rows_pad, Cout_pad), out_dtype),
        grid_spec=pltpu.PrefetchScalarGridSpec(
            num_scalar_prefetch=0,
            grid=(nr, nc, nk),
            in_specs=[
                pl.BlockSpec((tr, tk), lambda i, j, k: (i, k)),   # patches
                pl.BlockSpec((tk, tn), lambda i, j, k: (k, j)),   # fused weights
                pl.BlockSpec((1, tn), lambda i, j, k: (0, j)),    # fused bias
            ],
            out_specs=pl.BlockSpec((tr, tn), lambda i, j, k: (i, j)),
            scratch_shapes=[pltpu.VMEM((tr, tn), jnp.float32)],
        ),
        compiler_params=pltpu.CompilerParams(
            dimension_semantics=("parallel", "parallel", "arbitrary"),
            vmem_limit_bytes=vmem_limit,
        ),
        cost_estimate=pl.CostEstimate(
            flops=int(2 * rows_pad * K_pad * Cout_pad),
            transcendentals=0,
            bytes_accessed=int(rows_pad * K_pad * cd_b
                               + K_pad * Cout_pad * cd_b
                               + rows_pad * Cout_pad * out_b),
        ),
    )(patches, w_k, b_k)

    # TODO(synk): fuse the unpad + NHWC->NCHW into the consumer (or emit NCHW
    # from the kernel via an XLU transpose of acc) to drop this HBM pass.
    out = out2d[:rows, :Cout].reshape(N, Ho, Wo, Cout)
    return jnp.transpose(out, (0, 3, 1, 2))        # module contract: NCHW


if __name__ == "__main__":
    key = jax.random.PRNGKey(0)
    kx, kw_, kb, kg, kbt, km, kv = jax.random.split(key, 7)

    # Conv2d(4 -> 8, 3x3, stride=1, padding=1) + BN(8) + ReLU
    N, Cin, H, W = 2, 4, 16, 16
    Cout, KH, KW = 8, 3, 3
    stride, padding, dilation, groups = (1, 1), (1, 1), (1, 1), 1
    eps = 1e-5

    x = jax.random.normal(kx, (N, Cin, H, W), dtype=jnp.float32)
    weight = jax.random.normal(kw_, (Cout, Cin, KH, KW), dtype=jnp.float32) * 0.1
    conv_bias = jax.random.normal(kb, (Cout,), dtype=jnp.float32) * 0.1
    bn_gamma = jax.random.uniform(kg, (Cout,), minval=0.5, maxval=1.5)
    bn_beta = jax.random.normal(kbt, (Cout,), dtype=jnp.float32) * 0.1
    bn_mean = jax.random.normal(km, (Cout,), dtype=jnp.float32) * 0.1
    bn_var = jax.random.uniform(kv, (Cout,), minval=0.5, maxval=1.5)

    fn = functools.partial(
        conv_bn_relu,
        eps=eps,
        stride=stride,
        padding=padding,
        dilation=dilation,
        groups=groups,
    )
    out = jax.jit(fn)(x, weight, conv_bias, bn_gamma, bn_beta, bn_mean, bn_var)
    out = jax.block_until_ready(out)

    # Reference: same BN folding; inputs cast through bf16 to mirror the
    # kernel's bf16 compute / f32 accumulate (review: bf16 default needs a
    # bf16-aware reference), conv at HIGHEST precision.
    scale = bn_gamma / jnp.sqrt(bn_var + eps)
    w_fused = weight * scale[:, None, None, None]
    b_fused = scale * (conv_bias - bn_mean) + bn_beta
    x_bf = x.astype(jnp.bfloat16).astype(jnp.float32)
    w_bf = w_fused.astype(jnp.bfloat16).astype(jnp.float32)
    ref = lax.conv_general_dilated(
        x_bf,
        w_bf,
        window_strides=stride,
        padding=[(padding[0], padding[0]), (padding[1], padding[1])],
        rhs_dilation=dilation,
        dimension_numbers=("NCHW", "OIHW", "NCHW"),
        precision=lax.Precision.HIGHEST,
    ) + b_fused[None, :, None, None]
    ref = jnp.maximum(ref, 0.0)

    assert out.shape == (N, Cout, H, W)
    assert jnp.allclose(out, ref, atol=1e-2, rtol=1e-2), "mismatch vs reference"
    print("KERNEL_OK")
</pallas_src>

<mosaic_0001>
module attributes {stable_mosaic.version = 11 : i64} {
  func.func @_gemm_bias_relu_kernel(%arg0: i32, %arg1: i32, %arg2: i32, %arg3: memref<256x128xbf16, #tpu.memory_space<vmem>>, %arg4: memref<128x128xbf16, #tpu.memory_space<vmem>>, %arg5: memref<1x128xf32, #tpu.memory_space<vmem>>, %arg6: memref<256x128xf32, #tpu.memory_space<vmem>>, %arg7: memref<256x128xf32, #tpu.memory_space<vmem>>) attributes {dimension_semantics = [#tpu.dimension_semantics<parallel>, #tpu.dimension_semantics<parallel>, #tpu.dimension_semantics<arbitrary>], iteration_bounds = array<i64: 2, 1, 1>, scalar_prefetch = 0 : i64, scratch_operands = 1 : i64, tpu.core_type = #tpu.core_type<tc>, window_params = [{transform_indices = @transform_0, window_bounds = array<i64: 256, 128>}, {transform_indices = @transform_1, window_bounds = array<i64: 128, 128>}, {transform_indices = @transform_2, window_bounds = array<i64: 1, 128>}, {transform_indices = @transform_3, window_bounds = array<i64: 256, 128>}]} {
    %c0_i32 = arith.constant 0 : i32
    %0 = arith.cmpi eq, %arg2, %c0_i32 : i32
    %1 = arith.extui %0 : i1 to i32
    %c0_i32_0 = arith.constant 0 : i32
    %2 = arith.cmpi ne, %1, %c0_i32_0 : i32
    scf.if %2 {
      %cst_10 = arith.constant 0.000000e+00 : f32
      %12 = vector.broadcast %cst_10 : f32 to vector<256x128xf32>
      %c0_11 = arith.constant 0 : index
      %c0_12 = arith.constant 0 : index
      %13 = vector.load %arg7[%c0_11, %c0_12] : memref<256x128xf32, #tpu.memory_space<vmem>>, vector<256x128xf32>
      tpu.vector_store %arg7[%c0_11, %c0_12], %12 {strides = array<i32>} : memref<256x128xf32, #tpu.memory_space<vmem>>, vector<256x128xf32>,
    } else {
    }
    %c0 = arith.constant 0 : index
    %c0_1 = arith.constant 0 : index
    %3 = vector.load %arg7[%c0, %c0_1] : memref<256x128xf32, #tpu.memory_space<vmem>>, vector<256x128xf32>
    %c0_2 = arith.constant 0 : index
    %c0_3 = arith.constant 0 : index
    %4 = vector.load %arg3[%c0_2, %c0_3] : memref<256x128xbf16, #tpu.memory_space<vmem>>, vector<256x128xbf16>
    %c0_4 = arith.constant 0 : index
    %c0_5 = arith.constant 0 : index
    %5 = vector.load %arg4[%c0_4, %c0_5] : memref<128x128xbf16, #tpu.memory_space<vmem>>, vector<128x128xbf16>
    %cst = arith.constant dense<0.000000e+00> : vector<256x128xf32>
    %6 = tpu.matmul %4, %5, %cst {dimension_numbers = #tpu.dot_dimension_numbers<[1], [0], [0], [1], [0, 0, 1, 1], [], []>} : vector<256x128xbf16>, vector<128x128xbf16>, vector<256x128xf32> -> vector<256x128xf32>
    %7 = arith.addf %3, %6 : vector<256x128xf32>
    %c0_6 = arith.constant 0 : index
    %c0_7 = arith.constant 0 : index
    %8 = vector.load %arg7[%c0_6, %c0_7] : memref<256x128xf32, #tpu.memory_space<vmem>>, vector<256x128xf32>
    tpu.vector_store %arg7[%c0_6, %c0_7], %7 {strides = array<i32>} : memref<256x128xf32, #tpu.memory_space<vmem>>, vector<256x128xf32>,
    %c0_i32_8 = arith.constant 0 : i32
    %9 = arith.cmpi eq, %arg2, %c0_i32_8 : i32
    %10 = arith.extui %9 : i1 to i32
    %c0_i32_9 = arith.constant 0 : i32
    %11 = arith.cmpi ne, %10, %c0_i32_9 : i32
    scf.if %11 {
      %c0_10 = arith.constant 0 : index
      %c0_11 = arith.constant 0 : index
      %12 = vector.load %arg7[%c0_10, %c0_11] : memref<256x128xf32, #tpu.memory_space<vmem>>, vector<256x128xf32>
      %c0_12 = arith.constant 0 : index
      %c0_13 = arith.constant 0 : index
      %13 = vector.load %arg5[%c0_12, %c0_13] : memref<1x128xf32, #tpu.memory_space<vmem>>, vector<1x128xf32>
      %14 = vector.broadcast %13 : vector<1x128xf32> to vector<256x128xf32>
      %15 = arith.addf %12, %14 : vector<256x128xf32>
      %cst_14 = arith.constant 0.000000e+00 : f32
      %16 = vector.broadcast %cst_14 : f32 to vector<256x128xf32>
      %17 = arith.maximumf %15, %16 : vector<256x128xf32>
      %c0_15 = arith.constant 0 : index
      %c0_16 = arith.constant 0 : index
      %18 = vector.load %arg6[%c0_15, %c0_16] : memref<256x128xf32, #tpu.memory_space<vmem>>, vector<256x128xf32>
      tpu.vector_store %arg6[%c0_15, %c0_16], %17 {strides = array<i32>} : memref<256x128xf32, #tpu.memory_space<vmem>>, vector<256x128xf32>,
    } else {
    }
    return
  }
  func.func @transform_0(%arg0: i32, %arg1: i32, %arg2: i32) -> (i32, i32) {
    %c0_i32 = arith.constant 0 : i32
    return %arg0, %arg2 : i32, i32
  }
  func.func @transform_1(%arg0: i32, %arg1: i32, %arg2: i32) -> (i32, i32) {
    %c0_i32 = arith.constant 0 : i32
    return %arg2, %arg1 : i32, i32
  }
  func.func @transform_2(%arg0: i32, %arg1: i32, %arg2: i32) -> (i32, i32) {
    %c0_i32 = arith.constant 0 : i32
    %c0_i32_0 = arith.constant 0 : i32
    return %c0_i32, %arg1 : i32, i32
  }
  func.func @transform_3(%arg0: i32, %arg1: i32, %arg2: i32) -> (i32, i32) {
    %c0_i32 = arith.constant 0 : i32
    return %arg0, %arg1 : i32, i32
  }
}

</mosaic_0001>

<bundles_post_ra>
// kernel: conv_bn_relu.1
= control target key start
LH: loop header
LB: loop body
LE: loop exit
PB: predicated region body
PF: predicated region fallthrough
CT: control target
= control target key end

     0   :  { %s1212_s12 = smov 0   ;;  %s1214_s13 = smov 0   ;;  %s1362_s0 = inlined_call_operand.vmem [shape: bf16[512,128], index: 0, kind: input, shape index: {}]   ;;  %s1363_s1 = inlined_call_operand.vmem [shape: bf16[128,128], index: 1, kind: input, shape index: {}]   ;;  %s1364_s2 = inlined_call_operand.vmem [shape: f32[1,128], index: 2, kind: input, shape index: {}]   ;;  %s1365_s3 = inlined_call_operand.vmem [shape: f32[512,128], index: 3, kind: output, shape index: {}]  }
   0x1   :  { %s1216_s14 = smov 0  }
   0x2 LB: > { %s32_s15 = sadd.s32 1, %s1186_s13  ;;  %p1000_p0 = scmp.ge.s32.totalorder %s1190_s14, 1  ;;  %s1190_s14 = sphi %s1216_s14, %s13_s14   ;;  %s1186_s13 = sphi %s1214_s13, %s1367_s13   ;;  %s1182_s12 = sphi %s1212_s12, %s1366_s12  }
   0x3   : > { %p34_p1 = scmp.ge.s32.totalorder %s32_s15, 2  ;;  %p188_p2 = scmp.lt.s32.totalorder %s1190_s14, 3 }
   0x5   : > { %s1369_s15 = smov (%p34_p1, %s32_s15), 0  ;;  %p189_p3 = pnand %p1000_p0, %p188_p2 }
   0x6   : > { %v1144_v0 = vld [vmem:[%s1363_s1] sm:$0xff] (!%p189_p3)   ;;  %s1001_s18 = sshll.u32 (!%p189_p3), %s1182_s12, 5  ;;  %v1145_v1 = vld [vmem:[%s1363_s1 + $0x8] sm:$0xff] (!%p189_p3)   ;;  %v1146_v2 = vld [vmem:[%s1363_s1 + $0x10] sm:$0xff] (!%p189_p3)  }
   0x7   : > { %192 = sbr.rel (%p189_p3) target bundleno = 283 (0x11b), region = 32  ;;  %p230_p4 = scmp.lt.s32.totalorder (!%p189_p3), %s1001_s18, 63  ;;  %1056 = vmatprep.subr.bf16.mxu0 (!%p189_p3), %v1144_v0  ;;  %1104 = vmatprep.subr.bf16.mxu1 (!%p189_p3), %v1144_v0  ;;  %v1147_v3 = vld [vmem:[%s1363_s1 + $0x18] sm:$0xff] (!%p189_p3)   ;;  %v1148_v6 = vld [vmem:[%s1363_s1 + $0x20] sm:$0xff] (!%p189_p3)   ;;  %v1149_v7 = vld [vmem:[%s1363_s1 + $0x28] sm:$0xff] (!%p189_p3)  }
   0x8   : > { %1057 = vmatpush3.bf16.msra.mxu0 (!%p189_p3), %v1144_v0  ;;  %1112 = vmatpush3.bf16.msra.mxu1 (!%p189_p3), %v1144_v0  ;;  %v1150_v8 = vld [vmem:[%s1363_s1 + $0x30] sm:$0xff] (!%p189_p3)   ;;  %v1151_v9 = vld [vmem:[%s1363_s1 + $0x38] sm:$0xff] (!%p189_p3)   ;;  %v1281_v24 = vld [vmem:[%s1364_s2] ss:$0 sm:$0xff] (!%p189_p3) }
   0x9   : > { %1058 = vmatprep.subr.bf16.mxu0 (!%p189_p3), %v1145_v1  ;;  %1105 = vmatprep.subr.bf16.mxu1 (!%p189_p3), %v1145_v1 }
   0xc   : > { %1059 = vmatpush3.bf16.msra.mxu0 (!%p189_p3), %v1145_v1  ;;  %1113 = vmatpush3.bf16.msra.mxu1 (!%p189_p3), %v1145_v1 }
   0xd   : > { %1060 = vmatprep.subr.bf16.mxu0 (!%p189_p3), %v1146_v2  ;;  %1106 = vmatprep.subr.bf16.mxu1 (!%p189_p3), %v1146_v2 }
   0xe   : > { %s1371_s18 = smov (!%p230_p4, %s1001_s18), 63 }
   0xf   : > { %s1002_s23 = sshll.u32 %s1371_s18, 2  ;;  %s1004_s12 = sshll.u32 %s1371_s18, 3 }
  0x10   : > { %s1245_s26 = scalar_lea.vmem %s1362_s0, %s1002_s23  ;;  %1061 = vmatpush3.bf16.msra.mxu0 %v1146_v2  ;;  %1114 = vmatpush3.bf16.msra.mxu1 %v1146_v2  ;;  %s1289_s19 = scalar_lea.vmem %s1365_s3, %s1004_s12 }
  0x11   : > { %v1152_v4 = vld [vmem:[%s1245_s26] sm:$0xff]   ;;  %1062 = vmatprep.subr.bf16.mxu0 %v1147_v3  ;;  %1107 = vmatprep.subr.bf16.mxu1 %v1147_v3  ;;  %v1154_v10 = vld [vmem:[%s1245_s26 + $0x8] sm:$0xff]   ;;  %v1156_v12 = vld [vmem:[%s1245_s26 + $0x10] sm:$0xff]  }
  0x12   : > { %v1153_v5 = vld [vmem:[%s1245_s26 + $0x40] sm:$0xff]   ;;  %1072 = vmatprep.mubr.bf16.mxu0 %v1152_v4  ;;  %v1155_v11 = vld [vmem:[%s1245_s26 + $0x48] sm:$0xff]   ;;  %v1157_v13 = vld [vmem:[%s1245_s26 + $0x50] sm:$0xff]  }
  0x13   : > { %1088 = vmatprep.mubr.bf16.mxu1 %v1153_v5  ;;  %v1158_v14 = vld [vmem:[%s1245_s26 + $0x18] sm:$0xff]   ;;  %v1160_v16 = vld [vmem:[%s1245_s26 + $0x20] sm:$0xff]   ;;  %v1162_v18 = vld [vmem:[%s1245_s26 + $0x28] sm:$0xff]  }
  0x14   : > { %1063 = vmatpush3.bf16.msra.mxu0 %v1147_v3  ;;  %1115 = vmatpush3.bf16.msra.mxu1 %v1147_v3  ;;  %v1159_v15 = vld [vmem:[%s1245_s26 + $0x58] sm:$0xff]   ;;  %v1161_v17 = vld [vmem:[%s1245_s26 + $0x60] sm:$0xff]   ;;  %v1163_v19 = vld [vmem:[%s1245_s26 + $0x68] sm:$0xff]  }
  0x15   : > { %1064 = vmatprep.subr.bf16.mxu0 %v1148_v6  ;;  %1108 = vmatprep.subr.bf16.mxu1 %v1148_v6  ;;  %v1164_v20 = vld [vmem:[%s1245_s26 + $0x30] sm:$0xff]   ;;  %v1166_v22 = vld [vmem:[%s1245_s26 + $0x38] sm:$0xff]  }
  0x16   : > { %v1165_v21 = vld [vmem:[%s1245_s26 + $0x70] sm:$0xff]   ;;  %v1167_v23 = vld [vmem:[%s1245_s26 + $0x78] sm:$0xff]  }
  0x18   : > { %1065 = vmatpush3.bf16.msra.mxu0 %v1148_v6  ;;  %1116 = vmatpush3.bf16.msra.mxu1 %v1148_v6 }
  0x19   : > { %1066 = vmatprep.subr.bf16.mxu0 %v1149_v7  ;;  %1109 = vmatprep.subr.bf16.mxu1 %v1149_v7 }
  0x1c   : > { %1067 = vmatpush3.bf16.msra.mxu0 %v1149_v7  ;;  %1117 = vmatpush3.bf16.msra.mxu1 %v1149_v7 }
  0x1d   : > { %1068 = vmatprep.subr.bf16.mxu0 %v1150_v8  ;;  %1110 = vmatprep.subr.bf16.mxu1 %v1150_v8 }
  0x20   : > { %1069 = vmatpush3.bf16.msra.mxu0 %v1150_v8  ;;  %1118 = vmatpush3.bf16.msra.mxu1 %v1150_v8 }
  0x21   : > { %1070 = vmatprep.subr.bf16.mxu0 %v1151_v9  ;;  %1111 = vmatprep.subr.bf16.mxu1 %v1151_v9 }
  0x24   : > { %1071 = vmatpush3.bf16.msra.mxu0 %v1151_v9  ;;  %1119 = vmatpush3.bf16.msra.mxu1 %v1151_v9 }
  0x27   : > { %1073 = vmatmul.mubr.bf16.vlgmr.msra.gmra.mrb[0].mxu0 %v1154_v10  ;;  %1089 = vmatmul.mubr.bf16.vlgmr.msra.gmra.mrb[0].mxu1 %v1155_v11 }
  0x28   : > { %1076 = vmatprep.mubr.bf16.mxu0 %v1156_v12  ;;  %1092 = vmatprep.mubr.bf16.mxu1 %v1157_v13 }
  0x2f   : > { %1077 = vmatmul.mubr.bf16.gmra.mrb[4].mxu0 %v1158_v14  ;;  %1093 = vmatmul.mubr.bf16.gmra.mrb[4].mxu1 %v1159_v15 }
  0x30   : > { %1080 = vmatprep.mubr.bf16.mxu0 %v1160_v16  ;;  %1096 = vmatprep.mubr.bf16.mxu1 %v1161_v17 }
  0x37   : > { %1081 = vmatmul.mubr.bf16.gmra.mrb[8].mxu0 %v1162_v18  ;;  %1097 = vmatmul.mubr.bf16.gmra.mrb[8].mxu1 %v1163_v19 }
  0x38   : > { %1084 = vmatprep.mubr.bf16.mxu0 %v1164_v20  ;;  %1100 = vmatprep.mubr.bf16.mxu1 %v1165_v21 }
  0x3f   : > { %1085 = vmatmul.mubr.bf16.gmra.mrb[12].mxu0 %v1166_v22  ;;  %1101 = vmatmul.mubr.bf16.gmra.mrb[12].mxu1 %v1167_v23 }
  0xfa   : > { %v1074_v25 = vpop.f32.mrb[0].mxu0  ;;  %v1090_v26 = vpop.f32.mrb[0].mxu1 }
  0xfb   : > { %v789_v27 = vadd.f32 %v1074_v25, %v1281_v24  ;;  %v805_v28 = vadd.f32 %v1090_v26, %v1281_v24  ;;  %v554_v29 = vpop.f32.mrb[1].mxu0  ;;  %v618_v30 = vpop.f32.mrb[1].mxu1 }
  0xfc   : > { %v787_v31 = vadd.f32 %v1281_v24, %v554_v29  ;;  %v803_v32 = vadd.f32 %v1281_v24, %v618_v30  ;;  %v1075_v33 = vpop.f32.mrb[2].mxu0  ;;  %v1091_v34 = vpop.f32.mrb[2].mxu1 }
  0xfd   : > { %v821_v35 = vmax.f32 %v789_v27, 0.0  ;;  %v837_v36 = vmax.f32 %v805_v28, 0.0  ;;  %v790_v37 = vadd.f32 %v1075_v33, %v1281_v24  ;;  %v806_v38 = vadd.f32 %v1091_v34, %v1281_v24  ;;  %v557_v39 = vpop.f32.mrb[3].mxu0  ;;  %v621_v40 = vpop.f32.mrb[3].mxu1 }
  0xfe   : > { %v819_v41 = vmax.f32 %v787_v31, 0.0  ;;  %v835_v42 = vmax.f32 %v803_v32, 0.0  ;;  %v788_v43 = vadd.f32 %v1281_v24, %v557_v39  ;;  %v804_v44 = vadd.f32 %v1281_v24, %v621_v40 }
  0xff   : > { %853 = vst [vmem:[%s1289_s19 + $0x10] sm:$0xff] %v821_v35  ;;  %869 = vst [vmem:[%s1289_s19 + $0x90] sm:$0xff] %v837_v36  ;;  %v822_v45 = vmax.f32 %v790_v37, 0.0  ;;  %v838_v46 = vmax.f32 %v806_v38, 0.0 }
 0x100   : > { %851 = vst [vmem:[%s1289_s19] sm:$0xff] %v819_v41  ;;  %867 = vst [vmem:[%s1289_s19 + $0x80] sm:$0xff] %v835_v42  ;;  %v820_v47 = vmax.f32 %v788_v43, 0.0  ;;  %v836_v48 = vmax.f32 %v804_v44, 0.0 }
 0x101   : > { %854 = vst [vmem:[%s1289_s19 + $0x18] sm:$0xff] %v822_v45  ;;  %870 = vst [vmem:[%s1289_s19 + $0x98] sm:$0xff] %v838_v46 }
 0x102   : > { %852 = vst [vmem:[%s1289_s19 + $0x8] sm:$0xff] %v820_v47  ;;  %868 = vst [vmem:[%s1289_s19 + $0x88] sm:$0xff] %v836_v48  ;;  %v1078_v49 = vpop.f32.mrb[4].mxu0  ;;  %v1094_v50 = vpop.f32.mrb[4].mxu1 }
 0x103   : > { %v793_v51 = vadd.f32 %v1078_v49, %v1281_v24  ;;  %v809_v52 = vadd.f32 %v1094_v50, %v1281_v24  ;;  %v570_v53 = vpop.f32.mrb[5].mxu0  ;;  %v634_v54 = vpop.f32.mrb[5].mxu1 }
 0x104   : > { %v791_v55 = vadd.f32 %v1281_v24, %v570_v53  ;;  %v807_v56 = vadd.f32 %v1281_v24, %v634_v54  ;;  %v1079_v57 = vpop.f32.mrb[6].mxu0  ;;  %v1095_v58 = vpop.f32.mrb[6].mxu1 }
 0x105   : > { %v825_v59 = vmax.f32 %v793_v51, 0.0  ;;  %v841_v60 = vmax.f32 %v809_v52, 0.0  ;;  %v794_v61 = vadd.f32 %v1079_v57, %v1281_v24  ;;  %v810_v62 = vadd.f32 %v1095_v58, %v1281_v24  ;;  %v573_v63 = vpop.f32.mrb[7].mxu0  ;;  %v637_v0 = vpop.f32.mrb[7].mxu1 }
 0x106   : > { %v823_v1 = vmax.f32 %v791_v55, 0.0  ;;  %v839_v2 = vmax.f32 %v807_v56, 0.0  ;;  %v792_v3 = vadd.f32 %v1281_v24, %v573_v63  ;;  %v808_v4 = vadd.f32 %v1281_v24, %v637_v0 }
 0x107   : > { %857 = vst [vmem:[%s1289_s19 + $0x30] sm:$0xff] %v825_v59  ;;  %873 = vst [vmem:[%s1289_s19 + $0xb0] sm:$0xff] %v841_v60  ;;  %v826_v5 = vmax.f32 %v794_v61, 0.0  ;;  %v842_v6 = vmax.f32 %v810_v62, 0.0 }
 0x108   : > { %855 = vst [vmem:[%s1289_s19 + $0x20] sm:$0xff] %v823_v1  ;;  %871 = vst [vmem:[%s1289_s19 + $0xa0] sm:$0xff] %v839_v2  ;;  %v824_v7 = vmax.f32 %v792_v3, 0.0  ;;  %v840_v8 = vmax.f32 %v808_v4, 0.0 }
 0x109   : > { %858 = vst [vmem:[%s1289_s19 + $0x38] sm:$0xff] %v826_v5  ;;  %874 = vst [vmem:[%s1289_s19 + $0xb8] sm:$0xff] %v842_v6 }
 0x10a   : > { %856 = vst [vmem:[%s1289_s19 + $0x28] sm:$0xff] %v824_v7  ;;  %872 = vst [vmem:[%s1289_s19 + $0xa8] sm:$0xff] %v840_v8  ;;  %v1082_v9 = vpop.f32.mrb[8].mxu0  ;;  %v1098_v10 = vpop.f32.mrb[8].mxu1 }
 0x10b   : > { %v797_v11 = vadd.f32 %v1082_v9, %v1281_v24  ;;  %v813_v12 = vadd.f32 %v1098_v10, %v1281_v24  ;;  %v586_v13 = vpop.f32.mrb[9].mxu0  ;;  %v650_v14 = vpop.f32.mrb[9].mxu1 }
 0x10c   : > { %v795_v15 = vadd.f32 %v1281_v24, %v586_v13  ;;  %v811_v16 = vadd.f32 %v1281_v24, %v650_v14  ;;  %v1083_v17 = vpop.f32.mrb[10].mxu0  ;;  %v1099_v18 = vpop.f32.mrb[10].mxu1 }
 0x10d   : > { %v829_v19 = vmax.f32 %v797_v11, 0.0  ;;  %v845_v20 = vmax.f32 %v813_v12, 0.0  ;;  %v798_v21 = vadd.f32 %v1083_v17, %v1281_v24  ;;  %v814_v22 = vadd.f32 %v1099_v18, %v1281_v24  ;;  %v589_v23 = vpop.f32.mrb[11].mxu0  ;;  %v653_v25 = vpop.f32.mrb[11].mxu1 }
 0x10e   : > { %v827_v26 = vmax.f32 %v795_v15, 0.0  ;;  %v843_v27 = vmax.f32 %v811_v16, 0.0  ;;  %v796_v28 = vadd.f32 %v1281_v24, %v589_v23  ;;  %v812_v29 = vadd.f32 %v1281_v24, %v653_v25 }
 0x10f   : > { %861 = vst [vmem:[%s1289_s19 + $0x50] sm:$0xff] %v829_v19  ;;  %877 = vst [vmem:[%s1289_s19 + $0xd0] sm:$0xff] %v845_v20  ;;  %v830_v30 = vmax.f32 %v798_v21, 0.0  ;;  %v846_v31 = vmax.f32 %v814_v22, 0.0 }
 0x110   : > { %859 = vst [vmem:[%s1289_s19 + $0x40] sm:$0xff] %v827_v26  ;;  %875 = vst [vmem:[%s1289_s19 + $0xc0] sm:$0xff] %v843_v27  ;;  %v828_v32 = vmax.f32 %v796_v28, 0.0  ;;  %v844_v33 = vmax.f32 %v812_v29, 0.0 }
 0x111   : > { %862 = vst [vmem:[%s1289_s19 + $0x58] sm:$0xff] %v830_v30  ;;  %878 = vst [vmem:[%s1289_s19 + $0xd8] sm:$0xff] %v846_v31 }
 0x112   : > { %860 = vst [vmem:[%s1289_s19 + $0x48] sm:$0xff] %v828_v32  ;;  %876 = vst [vmem:[%s1289_s19 + $0xc8] sm:$0xff] %v844_v33  ;;  %v1086_v34 = vpop.f32.mrb[12].mxu0  ;;  %v1102_v35 = vpop.f32.mrb[12].mxu1 }
 0x113   : > { %v801_v36 = vadd.f32 %v1086_v34, %v1281_v24  ;;  %v817_v37 = vadd.f32 %v1102_v35, %v1281_v24  ;;  %v602_v38 = vpop.f32.mrb[13].mxu0  ;;  %v666_v39 = vpop.f32.mrb[13].mxu1 }
 0x114   : > { %v799_v40 = vadd.f32 %v1281_v24, %v602_v38  ;;  %v815_v41 = vadd.f32 %v1281_v24, %v666_v39  ;;  %v1087_v42 = vpop.f32.mrb[14].mxu0  ;;  %v1103_v43 = vpop.f32.mrb[14].mxu1 }
 0x115   : > { %v833_v44 = vmax.f32 %v801_v36, 0.0  ;;  %v849_v45 = vmax.f32 %v817_v37, 0.0  ;;  %v802_v46 = vadd.f32 %v1087_v42, %v1281_v24  ;;  %v818_v47 = vadd.f32 %v1103_v43, %v1281_v24  ;;  %v605_v48 = vpop.f32.mrb[15].mxu0  ;;  %v669_v49 = vpop.f32.mrb[15].mxu1 }
 0x116   : > { %v831_v50 = vmax.f32 %v799_v40, 0.0  ;;  %v847_v51 = vmax.f32 %v815_v41, 0.0  ;;  %v800_v52 = vadd.f32 %v1281_v24, %v605_v48  ;;  %v816_v53 = vadd.f32 %v1281_v24, %v669_v49 }
 0x117   : > { %865 = vst [vmem:[%s1289_s19 + $0x70] sm:$0xff] %v833_v44  ;;  %881 = vst [vmem:[%s1289_s19 + $0xf0] sm:$0xff] %v849_v45  ;;  %v834_v54 = vmax.f32 %v802_v46, 0.0  ;;  %v850_v55 = vmax.f32 %v818_v47, 0.0 }
 0x118   : > { %863 = vst [vmem:[%s1289_s19 + $0x60] sm:$0xff] %v831_v50  ;;  %879 = vst [vmem:[%s1289_s19 + $0xe0] sm:$0xff] %v847_v51  ;;  %v832_v56 = vmax.f32 %v800_v52, 0.0  ;;  %v848_v57 = vmax.f32 %v816_v53, 0.0 }
 0x119   : > { %866 = vst [vmem:[%s1289_s19 + $0x78] sm:$0xff] %v834_v54  ;;  %882 = vst [vmem:[%s1289_s19 + $0xf8] sm:$0xff] %v850_v55 }
 0x11a   : > { %864 = vst [vmem:[%s1289_s19 + $0x68] sm:$0xff] %v832_v56  ;;  %880 = vst [vmem:[%s1289_s19 + $0xe8] sm:$0xff] %v848_v57 }
 0x11b PF: > { %s13_s14 = sadd.s32 1, %s1190_s14   ;;  %s1366_s12 = smov %s1186_s13 }
 0x11c   : > { %p10_p5 = scmp.ge.s32.totalorder %s13_s14, 4   ;;  %s1367_s13 = smov %s1369_s15 }
 0x11e   :  { %12 = sbr.rel (!%p10_p5) target bundleno = 2 (0x2), region = 76 }

</bundles_post_ra>
